<compile_context>
chip_gen: v7x
topology: tpu7x:2x2x1
jax: 0.10.0
libtpu: 0.0.40
codegen_flags: <defaults>
</compile_context>

<pallas_src>
import functools

import jax
import jax.numpy as jnp
from jax import lax
from jax.experimental import pallas as pl
from jax.experimental.pallas import tpu as pltpu

_LANE = 128
_SUBLANE = 8


def _round_up(x, m):
    return ((x + m - 1) // m) * m


def skipgram_kernel(center_ref, ctx_ref, out_ref, *, num_context):
    # center_ref: (tb, E_pad) bf16/f32 block for this grid step.
    # ctx_ref:    (C_pad, E_pad) resident block (same for every step).
    # scores = center @ ctx.T, contracting the last dim of both operands
    # (no XLU transpose; MXU consumes both in natural row-major layout).
    scores = lax.dot_general(
        center_ref[...], ctx_ref[...],
        dimension_numbers=(((1,), (1,)), ((), ())),
        preferred_element_type=jnp.float32)            # (tb, C_pad) f32

    # Pad columns (context rows >= num_context are zero-filled) must not
    # affect the softmax: mask them to -inf before the max / sum reduction.
    if num_context < scores.shape[1]:
        col = lax.broadcasted_iota(jnp.int32, scores.shape, 1)
        scores = jnp.where(col < num_context, scores, jnp.float32(-jnp.inf))

    # Numerically stable log_softmax along the last axis (f32 math).
    m = jnp.max(scores, axis=1, keepdims=True)
    shifted = scores - m
    lse = jnp.log(jnp.sum(jnp.exp(shifted), axis=1, keepdims=True))
    out_ref[...] = shifted - lse


def skipgram_forward(center_words, context_words, emb_v, emb_u,
                     *, compute_dtype=jnp.bfloat16):
    B = center_words.shape[0]
    C = context_words.shape[0]
    _, E = emb_v.shape

    # Lane-dense padding of the embedding dim and the output column dim.
    E_pad = _round_up(max(E, _LANE), _LANE)
    C_pad = _round_up(max(C, _LANE), _LANE)
    # Tile B: 256 rows fills the v6e/v7x 256x256 MXU for large B; small B
    # just needs sublane alignment.
    if B >= 256:
        tb = 256
    else:
        tb = min(_LANE, _round_up(max(B, _SUBLANE), _SUBLANE))
    B_pad = _round_up(B, tb)
    num_tiles = B_pad // tb

    # Gather ONLY the needed rows in the wrapper (no whole-table pad/copy),
    # cast to the MXU compute dtype, and pad to lane-dense tiles.  Pad rows /
    # pad embedding columns are zeros, so they contribute 0 to the dot.
    center_embed = jnp.take(emb_v, center_words.astype(jnp.int32), axis=0)
    context_embed = jnp.take(emb_u, context_words.astype(jnp.int32), axis=0)
    center_embed = jnp.pad(center_embed.astype(compute_dtype),
                           ((0, B_pad - B), (0, E_pad - E)))
    context_embed = jnp.pad(context_embed.astype(compute_dtype),
                            ((0, C_pad - C), (0, E_pad - E)))

    grid_spec = pltpu.PrefetchScalarGridSpec(
        num_scalar_prefetch=0,
        grid=(num_tiles,),
        in_specs=[
            # Center rows: pipelined per-tile block.
            pl.BlockSpec((tb, E_pad), lambda i: (i, 0)),
            # Context rows: resident across all grid steps (DMA'd once).
            pl.BlockSpec((C_pad, E_pad), lambda i: (0, 0)),
        ],
        out_specs=pl.BlockSpec((tb, C_pad), lambda i: (i, 0)),
    )

    out_padded = pl.pallas_call(
        functools.partial(skipgram_kernel, num_context=C),
        out_shape=jax.ShapeDtypeStruct((B_pad, C_pad), jnp.float32),
        grid_spec=grid_spec,
        compiler_params=pltpu.CompilerParams(
            dimension_semantics=("parallel",)),
    )(center_embed, context_embed)

    return out_padded[:B, :C]


if __name__ == "__main__":
    vocab_size = 64
    embed_size = 32
    B = 8   # number of center words
    C = 8   # number of context words

    key = jax.random.PRNGKey(0)
    k_v, k_u, k_c, k_x = jax.random.split(key, 4)

    # nn.Embedding default init: N(0, 1)
    emb_v = jax.random.normal(k_v, (vocab_size, embed_size), dtype=jnp.float32)
    emb_u = jax.random.normal(k_u, (vocab_size, embed_size), dtype=jnp.float32)

    center_words = jax.random.randint(k_c, (B,), 0, vocab_size, dtype=jnp.int32)
    context_words = jax.random.randint(k_x, (C,), 0, vocab_size, dtype=jnp.int32)

    out = skipgram_forward(center_words, context_words, emb_v, emb_u)
    out = jax.block_until_ready(out)

    # Reference in plain JAX using the same bf16 MXU operands (f32 accum),
    # matching the kernel's compute dtype.
    ce = emb_v[center_words].astype(jnp.bfloat16)
    xe = emb_u[context_words].astype(jnp.bfloat16)
    ref_scores = lax.dot_general(ce, xe,
                                 dimension_numbers=(((1,), (1,)), ((), ())),
                                 preferred_element_type=jnp.float32)
    ref = jax.nn.log_softmax(ref_scores, axis=1)
    assert jnp.allclose(out, ref, atol=1e-4, rtol=1e-4), "mismatch vs reference"

    # Sanity vs the pure-f32 PyTorch-equivalent reference (bf16 rounding only).
    ref_f32 = jax.nn.log_softmax(emb_v[center_words] @ emb_u[context_words].T,
                                 axis=1)
    assert jnp.allclose(out, ref_f32, atol=5e-2, rtol=5e-2), "f32 sanity failed"

    print("KERNEL_OK")
</pallas_src>

<mosaic_0001>
module attributes {stable_mosaic.version = 11 : i64} {
  func.func @skipgram_kernel(%arg0: i32, %arg1: memref<8x128xbf16, #tpu.memory_space<vmem>>, %arg2: memref<128x128xbf16, #tpu.memory_space<vmem>>, %arg3: memref<8x128xf32, #tpu.memory_space<vmem>>) attributes {dimension_semantics = [#tpu.dimension_semantics<parallel>], iteration_bounds = array<i64: 1>, scalar_prefetch = 0 : i64, scratch_operands = 0 : i64, tpu.core_type = #tpu.core_type<tc>, window_params = [{transform_indices = @transform_0, window_bounds = array<i64: 8, 128>}, {pipeline_mode = #tpu.pipeline_mode<synchronous>, transform_indices = @transform_1, window_bounds = array<i64: 128, 128>}, {transform_indices = @transform_2, window_bounds = array<i64: 8, 128>}]} {
    %c0 = arith.constant 0 : index
    %c0_0 = arith.constant 0 : index
    %0 = vector.load %arg1[%c0, %c0_0] : memref<8x128xbf16, #tpu.memory_space<vmem>>, vector<8x128xbf16>
    %c0_1 = arith.constant 0 : index
    %c0_2 = arith.constant 0 : index
    %1 = vector.load %arg2[%c0_1, %c0_2] : memref<128x128xbf16, #tpu.memory_space<vmem>>, vector<128x128xbf16>
    %cst = arith.constant dense<0.000000e+00> : vector<8x128xf32>
    %2 = tpu.matmul %0, %1, %cst {dimension_numbers = #tpu.dot_dimension_numbers<[1], [1], [0], [0], [0, 0, 1, 0], [], []>} : vector<8x128xbf16>, vector<128x128xbf16>, vector<8x128xf32> -> vector<8x128xf32>
    %3 = tpu.iota {dimensions = array<i32: 1>} : vector<8x128xi32>
    %c8_i32 = arith.constant 8 : i32
    %4 = vector.broadcast %c8_i32 : i32 to vector<8x128xi32>
    %5 = arith.cmpi slt, %3, %4 : vector<8x128xi32>
    %cst_3 = arith.constant 0xFF800000 : f32
    %6 = vector.broadcast %cst_3 : f32 to vector<8x128xf32>
    %7 = arith.select %5, %2, %6 : vector<8x128xi1>, vector<8x128xf32>
    %cst_4 = arith.constant dense<0xFF800000> : vector<8xf32>
    %8 = vector.multi_reduction <maximumf>, %7, %cst_4 [1] : vector<8x128xf32> to vector<8xf32>
    %9 = vector.shape_cast %8 : vector<8xf32> to vector<8x1xf32>
    %10 = vector.broadcast %9 : vector<8x1xf32> to vector<8x128xf32>
    %11 = arith.subf %7, %10 : vector<8x128xf32>
    %12 = math.exp %11 : vector<8x128xf32>
    %cst_5 = arith.constant dense<0.000000e+00> : vector<8xf32>
    %13 = vector.multi_reduction <add>, %12, %cst_5 [1] : vector<8x128xf32> to vector<8xf32>
    %14 = vector.shape_cast %13 : vector<8xf32> to vector<8x1xf32>
    %15 = math.log %14 : vector<8x1xf32>
    %16 = vector.broadcast %15 : vector<8x1xf32> to vector<8x128xf32>
    %17 = arith.subf %11, %16 : vector<8x128xf32>
    %c0_6 = arith.constant 0 : index
    %c0_7 = arith.constant 0 : index
    %18 = vector.load %arg3[%c0_6, %c0_7] : memref<8x128xf32, #tpu.memory_space<vmem>>, vector<8x128xf32>
    tpu.vector_store %arg3[%c0_6, %c0_7], %17 {strides = array<i32>} : memref<8x128xf32, #tpu.memory_space<vmem>>, vector<8x128xf32>,
    return
  }
  func.func @transform_0(%arg0: i32) -> (i32, i32) {
    %c0_i32 = arith.constant 0 : i32
    %c0_i32_0 = arith.constant 0 : i32
    return %arg0, %c0_i32 : i32, i32
  }
  func.func @transform_1(%arg0: i32) -> (i32, i32) {
    %c0_i32 = arith.constant 0 : i32
    %c0_i32_0 = arith.constant 0 : i32
    %c0_i32_1 = arith.constant 0 : i32
    return %c0_i32, %c0_i32_0 : i32, i32
  }
  func.func @transform_2(%arg0: i32) -> (i32, i32) {
    %c0_i32 = arith.constant 0 : i32
    %c0_i32_0 = arith.constant 0 : i32
    return %arg0, %c0_i32 : i32, i32
  }
}

</mosaic_0001>

<bundles_post_ra>
// kernel: tpu_custom_call.1
= control target key start
LH: loop header
LB: loop body
LE: loop exit
PB: predicated region body
PF: predicated region fallthrough
CT: control target
= control target key end

     0   :  { %7 = vsyncpa [#allocation3], 0  ;;  %s368_s0 = inlined_call_operand.hbm [shape: bf16[8,128], index: 0, kind: input, shape index: {}]   ;;  %s369_s1 = inlined_call_operand.hbm [shape: bf16[128,128], index: 1, kind: input, shape index: {}]   ;;  %s370_s2 = inlined_call_operand.hbm [shape: f32[8,128], index: 2, kind: output, shape index: {}]  }
   0x1   :  { %8 = vsyncpa [#allocation6], 0 }
   0x2   :  { %9 = vsyncpa [#allocation4], 0  ;;  %s303_s9 = smov [#allocation2]   ;;  %s304_s11 = smov [#allocation5]  }
   0x3   :  { %s16_s10 = sshll.u32 %s303_s9, 4  ;;  %s25_s12 = sshll.u32 %s304_s11, 4  ;;  %s17_s10 = int_to_ptr.vmem [resolvable:$true] %s16_s10  ;;  %s325_s12 = int_to_ptr.vmem [resolvable:$true] %s25_s12 }
   0x4   :  { %s231_s15 = scalar_lea.hbm %s368_s0, 64 }
   0x5   :  { %p232_p0 = scmp.ne.s32.totalorder %s368_s0, %s231_s15  ;;  %p235_p1 = scmp.lt.u32.totalorder %s231_s15, %s368_s0 }
   0x7   :  { %p237_p2 = pnand %p235_p1, %p232_p0 }
   0x9   :  { %240 = shalt.err (!%p237_p2)
}
   0xa   :  { %s241_s20 = scalar_lea.vmem %s17_s10, 64  ;;  %p246_p4 = scmp.lt.s32.totalorder %s17_s10, %s17_s10 }
   0xb   :  { %p242_p3 = scmp.ne.s32.totalorder %s17_s10, %s241_s20  ;;  %p247_p5 = scmp.lt.s32.totalorder %s241_s20, %s241_s20 }
   0xd   :  { %p248_p6 = por %p247_p5, %p246_p4 }
   0xf   :  { %p249_p7 = pnand %p248_p6, %p242_p3 }
  0x11   :  { %252 = shalt.err (!%p249_p7)
}
  0x12   :  { %19 = dma.hbm_to_vmem [thread:$0]  %s368_s0, 64, %s17_s10, [#allocation3]  }
  0x13   :  { %s253_s25 = scalar_lea.hbm %s369_s1, 1024 }
  0x14   :  { %p254_p8 = scmp.ne.s32.totalorder %s369_s1, %s253_s25  ;;  %p257_p9 = scmp.lt.u32.totalorder %s253_s25, %s369_s1 }
  0x16   :  { %p259_p10 = pnand %p257_p9, %p254_p8 }
  0x18   :  { %262 = shalt.err (!%p259_p10)
}
  0x19   :  { %s263_s30 = scalar_lea.vmem %s325_s12, 1024  ;;  %p268_p12 = scmp.lt.s32.totalorder %s325_s12, %s325_s12 }
  0x1a   :  { %p264_p11 = scmp.ne.s32.totalorder %s325_s12, %s263_s30  ;;  %p269_p13 = scmp.lt.s32.totalorder %s263_s30, %s263_s30 }
  0x1c   :  { %p270_p0 = por %p269_p13, %p268_p12 }
  0x1e   :  { %p271_p1 = pnand %p270_p0, %p264_p11 }
  0x20   :  { %274 = shalt.err (!%p271_p1)
}
  0x21   :  { %s305_s0 = smov 64   ;;  %s306_s3 = smov 4  }
  0x22   :  { %31 = dma.hbm_to_vmem [thread:$0]  %s369_s1, 1024, %s325_s12, [#allocation6], %s305_s0, %s305_s0, %s306_s3  }
  0x23   :  { %297 = dma.done.wait [#allocation3], 64  }
  0x24   :  { %298 = vsyncadd [#allocation3], 4294967232 }
  0x25   :  { %299 = dma.done.wait [#allocation6], 1024  }
  0x26   :  { %300 = vsyncadd [#allocation6], 4294966272  ;;  %v307_v0 = vmov 0.0   ;;  %vm308_vm0 = vmmov 0   ;;  %v219_v1 = vld [vmem:[#allocation5] sm:$0xff]   ;;  %v220_v2 = vld [vmem:[#allocation5 + $0x8] sm:$0xff]   ;;  %v144_v10 = vlaneseq }
  0x27   :  { %192 = vmatprep.subr.bf16.mxu0 %v307_v0  ;;  %208 = vmatprep.mubr.msk.bf16.mxu0 %vm308_vm0, %v307_v0  ;;  %v221_v3 = vld [vmem:[#allocation5 + $0x10] sm:$0xff]   ;;  %v222_v4 = vld [vmem:[#allocation5 + $0x18] sm:$0xff]   ;;  %v223_v5 = vld [vmem:[#allocation5 + $0x20] sm:$0xff]   ;;  %s309_s1 = smov [#allocation7]  }
  0x28   :  { %193 = vmatpush3.bf16.xpose.msra.mxu0 %v219_v1  ;;  %v224_v6 = vld [vmem:[#allocation5 + $0x28] sm:$0xff]   ;;  %v225_v7 = vld [vmem:[#allocation5 + $0x30] sm:$0xff]   ;;  %v226_v8 = vld [vmem:[#allocation5 + $0x38] sm:$0xff]   ;;  %v145_v11 = vand.u32 127, %v144_v10  ;;  %s165_s6 = sshll.u32 %s309_s1, 4  ;;  %s166_s6 = int_to_ptr.vmem [resolvable:$true] %s165_s6 }
  0x29   :  { %194 = vmatprep.subr.bf16.mxu0 %v307_v0  ;;  %v39_v9 = vld [vmem:[#allocation2] sm:$0xf]  ;;  %s275_s7 = scalar_lea.vmem %s166_s6, 128  ;;  %p280_p3 = scmp.lt.s32.totalorder %s166_s6, %s166_s6 }
  0x2a   :  { %vm146_vm1 = vcmp.lt.s32.totalorder %v145_v11, 8  ;;  %p276_p2 = scmp.ne.s32.totalorder %s166_s6, %s275_s7  ;;  %p281_p4 = scmp.lt.s32.totalorder %s275_s7, %s275_s7 }
  0x2c   :  { %p282_p5 = por %p281_p4, %p280_p3 }
  0x2e   :  { %p283_p6 = pnand %p282_p5, %p276_p2 }
  0x30   :  { %195 = vmatpush3.bf16.xpose.msra.mxu0 %v220_v2 }
  0x31   :  { %196 = vmatprep.subr.bf16.mxu0 %v307_v0 }
  0x38   :  { %197 = vmatpush3.bf16.xpose.msra.mxu0 %v221_v3 }
  0x39   :  { %198 = vmatprep.subr.bf16.mxu0 %v307_v0 }
  0x40   :  { %199 = vmatpush3.bf16.xpose.msra.mxu0 %v222_v4 }
  0x41   :  { %200 = vmatprep.subr.bf16.mxu0 %v307_v0 }
  0x48   :  { %201 = vmatpush3.bf16.xpose.msra.mxu0 %v223_v5 }
  0x49   :  { %202 = vmatprep.subr.bf16.mxu0 %v307_v0 }
  0x50   :  { %203 = vmatpush3.bf16.xpose.msra.mxu0 %v224_v6 }
  0x51   :  { %204 = vmatprep.subr.bf16.mxu0 %v307_v0 }
  0x58   :  { %205 = vmatpush3.bf16.xpose.msra.mxu0 %v225_v7 }
  0x59   :  { %206 = vmatprep.subr.bf16.mxu0 %v307_v0 }
  0x60   :  { %207 = vmatpush3.bf16.xpose.msra.mxu0 %v226_v8 }
  0x67   :  { %209 = vmatmul.mubr.bf16.vlgmr.msra.gmra.mrb[0].mxu0 %v39_v9 }
 0x13a   :  { %v138_v12 = vpop.f32.mrb[0].mxu0 }
 0x13b   :  { %v210_v13 = vpop.f32.mrb[1].mxu0  ;;  %v147_v14 = vsel %vm146_vm1, %v138_v12, -inf }
 0x13c   :  { %148 = vmax.xlane.f32.xlu0 %v147_v14  ;;  %v141_v15 = vpop.f32.mrb[2].mxu0 }
 0x13d   :  { %v211_v16 = vpop.f32.mrb[3].mxu0 }
 0x1c9   :  { %v149_v17 = vpop.xlane.xlu0 %148 }
 0x1ca   :  { %v150_v18 = vsub.f32 %v147_v14, %v149_v17 }
 0x1cc   :  { %v151_v19 = vmul.f32 1.442695, %v150_v18 }
 0x1ce   :  { %227 = vpow2.f32 %v151_v19 }
 0x1d8   :  { %v228_v20 = vpop.eup %227 }
 0x1d9   :  { %153 = vadd.xlane.f32.xlu0 %v228_v20 }
 0x266   :  { %v154_v21 = vpop.xlane.xlu0 %153 }
 0x267   :  { %229 = vlog2.f32 %v154_v21 }
 0x271   :  { %v230_v22 = vpop.eup %229 }
 0x272   :  { %v156_v23 = vmul.f32 0.6931472, %v230_v22 }
 0x274   :  { %v157_v24 = vsub.f32 %v150_v18, %v156_v23 }
 0x276   :  { %158 = vst [vmem:[#allocation7] sm:$0xff] %v157_v24 }
 0x277   :  { %286 = shalt.err (!%p283_p6)
}
 0x278   :  { %s287_s10 = scalar_lea.hbm %s370_s2, 128 }
 0x279   :  { %p288_p7 = scmp.ne.s32.totalorder %s370_s2, %s287_s10  ;;  %p291_p8 = scmp.lt.u32.totalorder %s287_s10, %s370_s2 }
 0x27b   :  { %p293_p9 = pnand %p291_p8, %p288_p7 }
 0x27d   :  { %296 = shalt.err (!%p293_p9)
}
 0x27e   :  { %168 = dma.vmem_to_hbm [thread:$0]  %s166_s6, 128, %s370_s2, [#allocation4]  }
 0x27f   :  { %301 = dma.done.wait [#allocation4], 128  }
 0x280   :  { %302 = vsyncadd [#allocation4], 4294967168 }
 0x281   :  { %172 = vsyncpa [#allocation3], 1 }
 0x282   :  { %173 = vsyncpa [#allocation6], 1 }
 0x283   :  { %174 = vsyncpa [#allocation4], 1 }

</bundles_post_ra>
